<compile_context>
chip_gen: v6e
topology: v6e:2x2x1
jax: 0.10.0
libtpu: 0.0.40
codegen_flags: <defaults>
</compile_context>

<pallas_src>
import math

import jax
import jax.numpy as jnp
from jax.experimental import pallas as pl
from jax.experimental.pallas import tpu as pltpu


def _pick_tile(n_pixels, rows_in, rows_out, budget_bytes=8 << 20):
    """Largest lane-dense tile (multiple of 128) dividing n_pixels whose
    double-buffered working set stays under budget; falls back to n_pixels."""
    bytes_per_col = 2 * (3 * rows_in + rows_out) * 4  # x, z, noise, y; 2x buffered
    for t in (16384, 8192, 4096, 2048, 1024, 512, 256, 128):
        if n_pixels % t == 0 and t * bytes_per_col <= budget_bytes:
            return t
    return n_pixels


def _split_kernel(amp_ref, w_ref, b_ref, x_ref, z_ref, y_ref, noise_ref):
    """AWGN scale+add + 1x1-conv channel mix, fused, on a (B*C, TILE) slab.

    amp_ref   : SMEM (1,)               f32  global noise amplitude sqrt(P/SNR)
    w_ref     : VMEM (B*C_out, B*C_in)  f32  block-diagonal 1x1 conv weight
    b_ref     : VMEM (B*C_out, 1)       f32  per-row conv bias
    x_ref     : VMEM (B*C_in,  T)       f32  latents tile (NCHW-contiguous rows)
    z_ref     : VMEM (B*C_in,  T)       f32  standard-normal tile
    y_ref     : VMEM (B*C_out, T)       f32  conv(latents + noise) tile
    noise_ref : VMEM (B*C_in,  T)       f32  the AWGN noise that was added
    """
    noise = z_ref[...] * amp_ref[0]           # scale unit normals by amplitude
    noise_ref[...] = noise
    noised = x_ref[...] + noise
    # post_quant_conv (1x1) for all batches at once: a single small matmul
    # against a block-diagonal weight (no per-row slicing / concatenation).
    y_ref[...] = (
        jnp.dot(w_ref[...], noised, preferred_element_type=jnp.float32)
        + b_ref[...]
    )


def split_model_forward(latents, conv_w, conv_b, snr_db=0.0, seed=0,
                        is_train=False, channel_noise=None):
    """latents: (B, C, H, W) float32 (NCHW, like the PyTorch module).

    Returns (y, channel_noise):
      y             : (B, C_out, H, W)  post_quant_conv(latents + noise)
      channel_noise : (B*C*H*W,)        flat AWGN noise (same ordering as
                                        PyTorch's reshape(b*c*w*h))
    """
    B, C, H, W = latents.shape
    C_out = conv_w.shape[0]
    N = H * W
    BC = B * C
    BCo = B * C_out

    # Zero-copy view: NCHW contiguous == (B*C, H*W) row-major slab.
    x2d = latents.reshape(BC, N).astype(jnp.float32)

    if channel_noise is None:
        # Global signal power: GLOBAL mean of squares, hoisted out of the tiled
        # kernel so tiles stay independent / pipelineable.
        power = jnp.mean(jnp.square(x2d))
        snr_lin = jnp.float32(10.0 ** (float(snr_db) / 10.0))
        if is_train:
            k_noise, k_jit = jax.random.split(jax.random.PRNGKey(seed))
            jitter = 2.0 * jax.random.uniform(k_jit, (), dtype=jnp.float32) + 0.5
            noise_power = power / snr_lin * jitter
        else:
            k_noise = jax.random.PRNGKey(seed)
            noise_power = power / snr_lin
        noise_amp = jnp.sqrt(noise_power)
        # TODO(synk): in-kernel pltpu.prng_random_bits + Box-Muller would save one
        # HBM stream but previously failed to lower; portable path used instead.
        z2d = jax.random.normal(k_noise, (BC, N), dtype=jnp.float32)
    else:
        noise_amp = jnp.float32(1.0)
        z2d = jnp.asarray(channel_noise, jnp.float32).reshape(BC, N)

    amp_arr = jnp.reshape(noise_amp, (1,)).astype(jnp.float32)

    # Block-diagonal weight (same 1x1 conv applied to every batch) and a
    # per-output-row bias column, so the kernel does a single matmul.
    w2d = conv_w.reshape(C_out, C).astype(jnp.float32)
    w_bd = jnp.kron(jnp.eye(B, dtype=jnp.float32), w2d)          # (BCo, BC)
    b_col = jnp.tile(conv_b.reshape(C_out).astype(jnp.float32), B).reshape(BCo, 1)

    tile = _pick_tile(N, BC, BCo)
    grid = (N // tile,)

    y2d, noise2d = pl.pallas_call(
        _split_kernel,
        grid=grid,
        in_specs=[
            pl.BlockSpec(memory_space=pltpu.MemorySpace.SMEM),   # noise amplitude
            pl.BlockSpec((BCo, BC), lambda i: (0, 0)),           # block-diag weight
            pl.BlockSpec((BCo, 1), lambda i: (0, 0)),            # bias column
            pl.BlockSpec((BC, tile), lambda i: (0, i)),          # latents slab
            pl.BlockSpec((BC, tile), lambda i: (0, i)),          # unit-normal slab
        ],
        out_specs=(
            pl.BlockSpec((BCo, tile), lambda i: (0, i)),         # y
            pl.BlockSpec((BC, tile), lambda i: (0, i)),          # noise
        ),
        out_shape=(
            jax.ShapeDtypeStruct((BCo, N), jnp.float32),
            jax.ShapeDtypeStruct((BC, N), jnp.float32),
        ),
        compiler_params=pltpu.CompilerParams(
            dimension_semantics=("parallel",)),
    )(amp_arr, w_bd, b_col, x2d, z2d)

    # Outputs are already NCHW-contiguous: plain reshapes, no transposes.
    y = y2d.reshape(B, C_out, H, W)
    channel_noise_flat = noise2d.reshape(-1)

    # TODO(synk): apply diffusers Decoder(...) to `y` here (source not provided).
    return y, channel_noise_flat


if __name__ == "__main__":
    key = jax.random.PRNGKey(0)
    k_lat, k_w, k_b = jax.random.split(key, 3)

    # Small shapes consistent with the module: 4 latent channels, NCHW.
    B, C, H, W = 2, 4, 16, 16
    latents = jax.random.normal(k_lat, (B, C, H, W), dtype=jnp.float32)

    # Deterministic init of post_quant_conv = Conv2d(4, 4, kernel_size=1)
    bound = 1.0 / math.sqrt(C)
    conv_w = jax.random.uniform(k_w, (C, C, 1, 1), jnp.float32, -bound, bound)
    conv_b = jax.random.uniform(k_b, (C,), jnp.float32, -bound, bound)

    seed = 42
    y, channel_noise = split_model_forward(latents, conv_w, conv_b,
                                           snr_db=0.0, seed=seed)
    jax.block_until_ready((y, channel_noise))

    # Plain-JAX reference (same noise realization) for a correctness check.
    snr = 10.0 ** (0.0 / 10.0)
    amp_ref = jnp.sqrt(jnp.mean(jnp.square(latents)) / snr)
    z_ref = jax.random.normal(jax.random.PRNGKey(seed), (B * C, H * W),
                              dtype=jnp.float32)
    noise_ref = (z_ref * amp_ref).reshape(B, C, H, W)
    noised_ref = latents + noise_ref
    y_ref = jnp.einsum("oc,bchw->bohw", conv_w.reshape(C, C), noised_ref) \
            + conv_b.reshape(1, C, 1, 1)

    assert y.shape == (B, C, H, W)
    assert channel_noise.shape == (B * C * H * W,)
    assert bool(jnp.all(jnp.isfinite(y)))
    assert bool(jnp.allclose(channel_noise.reshape(B, C, H, W), noise_ref,
                             atol=1e-5, rtol=1e-5))
    assert bool(jnp.allclose(y, y_ref, atol=1e-4, rtol=1e-4))
    print("KERNEL_OK")
</pallas_src>

<mosaic_0001>
module attributes {stable_mosaic.version = 11 : i64} {
  func.func @_split_kernel(%arg0: i32, %arg1: memref<1xf32, #tpu.memory_space<smem>>, %arg2: memref<8x8xf32, #tpu.memory_space<vmem>>, %arg3: memref<8x1xf32, #tpu.memory_space<vmem>>, %arg4: memref<8x256xf32, #tpu.memory_space<vmem>>, %arg5: memref<8x256xf32, #tpu.memory_space<vmem>>, %arg6: memref<8x256xf32, #tpu.memory_space<vmem>>, %arg7: memref<8x256xf32, #tpu.memory_space<vmem>>) attributes {dimension_semantics = [#tpu.dimension_semantics<parallel>], iteration_bounds = array<i64: 1>, scalar_prefetch = 0 : i64, scratch_operands = 0 : i64, tpu.core_type = #tpu.core_type<tc>, window_params = [{transform_indices = @transform_0, window_bounds = array<i64: 1>}, {pipeline_mode = #tpu.pipeline_mode<synchronous>, transform_indices = @transform_1, window_bounds = array<i64: 8, 8>}, {pipeline_mode = #tpu.pipeline_mode<synchronous>, transform_indices = @transform_2, window_bounds = array<i64: 8, 1>}, {transform_indices = @transform_3, window_bounds = array<i64: 8, 256>}, {transform_indices = @transform_4, window_bounds = array<i64: 8, 256>}, {transform_indices = @transform_5, window_bounds = array<i64: 8, 256>}, {transform_indices = @transform_6, window_bounds = array<i64: 8, 256>}]} {
    %c0 = arith.constant 0 : index
    %c0_0 = arith.constant 0 : index
    %0 = vector.load %arg5[%c0, %c0_0] : memref<8x256xf32, #tpu.memory_space<vmem>>, vector<8x256xf32>
    %c0_1 = arith.constant 0 : index
    %1 = memref.load %arg1[%c0_1] : memref<1xf32, #tpu.memory_space<smem>>
    %2 = vector.broadcast %1 : f32 to vector<8x256xf32>
    %3 = arith.mulf %0, %2 : vector<8x256xf32>
    %c0_2 = arith.constant 0 : index
    %c0_3 = arith.constant 0 : index
    %4 = vector.load %arg7[%c0_2, %c0_3] : memref<8x256xf32, #tpu.memory_space<vmem>>, vector<8x256xf32>
    tpu.vector_store %arg7[%c0_2, %c0_3], %3 {strides = array<i32>} : memref<8x256xf32, #tpu.memory_space<vmem>>, vector<8x256xf32>,
    %c0_4 = arith.constant 0 : index
    %c0_5 = arith.constant 0 : index
    %5 = vector.load %arg4[%c0_4, %c0_5] : memref<8x256xf32, #tpu.memory_space<vmem>>, vector<8x256xf32>
    %6 = arith.addf %5, %3 : vector<8x256xf32>
    %c0_6 = arith.constant 0 : index
    %c0_7 = arith.constant 0 : index
    %7 = vector.load %arg2[%c0_6, %c0_7] : memref<8x8xf32, #tpu.memory_space<vmem>>, vector<8x8xf32>
    %cst = arith.constant dense<0.000000e+00> : vector<8x256xf32>
    %8 = tpu.matmul %7, %6, %cst {dimension_numbers = #tpu.dot_dimension_numbers<[1], [0], [0], [1], [0, 0, 1, 1], [], []>} : vector<8x8xf32>, vector<8x256xf32>, vector<8x256xf32> -> vector<8x256xf32>
    %c0_8 = arith.constant 0 : index
    %c0_9 = arith.constant 0 : index
    %9 = vector.load %arg3[%c0_8, %c0_9] : memref<8x1xf32, #tpu.memory_space<vmem>>, vector<8x1xf32>
    %10 = vector.broadcast %9 : vector<8x1xf32> to vector<8x256xf32>
    %11 = arith.addf %8, %10 : vector<8x256xf32>
    %c0_10 = arith.constant 0 : index
    %c0_11 = arith.constant 0 : index
    %12 = vector.load %arg6[%c0_10, %c0_11] : memref<8x256xf32, #tpu.memory_space<vmem>>, vector<8x256xf32>
    tpu.vector_store %arg6[%c0_10, %c0_11], %11 {strides = array<i32>} : memref<8x256xf32, #tpu.memory_space<vmem>>, vector<8x256xf32>,
    return
  }
  func.func @transform_0(%arg0: i32) -> i32 {
    %c0_i32 = arith.constant 0 : i32
    %c0_i32_0 = arith.constant 0 : i32
    return %c0_i32 : i32
  }
  func.func @transform_1(%arg0: i32) -> (i32, i32) {
    %c0_i32 = arith.constant 0 : i32
    %c0_i32_0 = arith.constant 0 : i32
    %c0_i32_1 = arith.constant 0 : i32
    return %c0_i32, %c0_i32_0 : i32, i32
  }
  func.func @transform_2(%arg0: i32) -> (i32, i32) {
    %c0_i32 = arith.constant 0 : i32
    %c0_i32_0 = arith.constant 0 : i32
    %c0_i32_1 = arith.constant 0 : i32
    return %c0_i32, %c0_i32_0 : i32, i32
  }
  func.func @transform_3(%arg0: i32) -> (i32, i32) {
    %c0_i32 = arith.constant 0 : i32
    %c0_i32_0 = arith.constant 0 : i32
    return %c0_i32, %arg0 : i32, i32
  }
  func.func @transform_4(%arg0: i32) -> (i32, i32) {
    %c0_i32 = arith.constant 0 : i32
    %c0_i32_0 = arith.constant 0 : i32
    return %c0_i32, %arg0 : i32, i32
  }
  func.func @transform_5(%arg0: i32) -> (i32, i32) {
    %c0_i32 = arith.constant 0 : i32
    %c0_i32_0 = arith.constant 0 : i32
    return %c0_i32, %arg0 : i32, i32
  }
  func.func @transform_6(%arg0: i32) -> (i32, i32) {
    %c0_i32 = arith.constant 0 : i32
    %c0_i32_0 = arith.constant 0 : i32
    return %c0_i32, %arg0 : i32, i32
  }
}

</mosaic_0001>

<bundles_post_ra>
// kernel: tpu_custom_call.1
= control target key start
LH: loop header
LB: loop body
LE: loop exit
PB: predicated region body
PF: predicated region fallthrough
CT: control target
= control target key end

     0   :  { %13 = vsyncpa [#allocation4], 0  ;;  %s336_s0 = inlined_call_operand.<no memory space> [shape: f32[1], index: 0, kind: input, shape index: {}]   ;;  %s337_s1 = inlined_call_operand.hbm [shape: f32[8,8], index: 1, kind: input, shape index: {}]   ;;  %s338_s2 = inlined_call_operand.vmem [shape: f32[8,1], index: 2, kind: input, shape index: {}]   ;;  %s339_s3 = inlined_call_operand.hbm [shape: f32[8,256], index: 3, kind: input, shape index: {}]   ;;  %s340_s4 = inlined_call_operand.vmem [shape: f32[8,256], index: 4, kind: input, shape index: {}]   ;;  %s341_s5 = inlined_call_operand.hbm [shape: f32[8,256], index: 5, kind: output, shape index: {0}]   ;;  %s342_s6 = inlined_call_operand.hbm [shape: f32[8,256], index: 6, kind: output, shape index: {1}]  }
   0x1   :  { %14 = vsyncpa [#allocation7], 0 }
   0x2   :  { %15 = vsyncpa [#allocation5], 0 }
   0x3   :  { %16 = vsyncpa [#allocation10], 0  ;;  %s271_s21 = smov [#allocation3]   ;;  %s272_s23 = smov [#allocation6]  }
   0x4   :  { %s25_s22 = sshll.u32 %s271_s21, 4  ;;  %s37_s24 = sshll.u32 %s272_s23, 4  ;;  %s26_s22 = int_to_ptr.vmem [resolvable:$true] %s25_s22  ;;  %s38_s24 = int_to_ptr.vmem [resolvable:$true] %s37_s24 }
   0x5   :  { %s191_s25 = scalar_lea.vmem %s26_s22, 128  ;;  %p196_p1 = scmp.lt.s32.totalorder %s26_s22, %s26_s22 }
   0x6   :  { %p192_p0 = scmp.ne.s32.totalorder %s26_s22, %s191_s25  ;;  %p197_p2 = scmp.lt.s32.totalorder %s191_s25, %s191_s25 }
   0x8   :  { %p198_p3 = por %p197_p2, %p196_p1 }
   0xa   :  { %p199_p4 = pnand %p198_p3, %p192_p0 }
   0xc   :  { %202 = shalt.err (!%p199_p4)
}
   0xd   :  { %28 = dma.hbm_to_vmem [thread:$0]  %s337_s1, 128, %s26_s22, [#allocation4]  }
   0xe   :  { %s211_s28 = scalar_lea.vmem %s38_s24, 256  ;;  %p216_p6 = scmp.lt.s32.totalorder %s38_s24, %s38_s24 }
   0xf   :  { %p212_p5 = scmp.ne.s32.totalorder %s38_s24, %s211_s28  ;;  %p217_p7 = scmp.lt.s32.totalorder %s211_s28, %s211_s28 }
  0x11   :  { %p218_p8 = por %p217_p7, %p216_p6 }
  0x13   :  { %p219_p9 = pnand %p218_p8, %p212_p5 }
  0x15   :  { %222 = shalt.err (!%p219_p9)
}
  0x16   :  { %40 = dma.hbm_to_vmem [thread:$0]  %s339_s3, 256, %s38_s24, [#allocation7]  }
  0x17   :  { %263 = dma.done.wait [#allocation4], 128  }
  0x18   :  { %264 = vsyncadd [#allocation4], 4294967168 }
  0x19   :  { %265 = dma.done.wait [#allocation7], 256  }
  0x1a   :  { %266 = vsyncadd [#allocation7], 4294967040  ;;  %v273_v0 = vmov 0.0   ;;  %v274_v1 = vmov 0   ;;  %v52_v2 = vstv %s336_s0  ;;  %v50_v3 = vld [vmem:[%s340_s4 + $0x8] sm:$0xff]  ;;  %v58_v4 = vld [vmem:[#allocation6 + $0x8] sm:$0xff] }
  0x1b   :  { %136 = vmatprep.mubr.f32.mxu0 %v273_v0  ;;  %182 = vset.pattern.permute.xlu0 %v274_v1  ;;  %v49_v5 = vld [vmem:[%s340_s4] sm:$0xff]  ;;  %v54_v6 = vmul.f32 %v52_v2, %v50_v3  ;;  %v57_v8 = vld [vmem:[#allocation6] sm:$0xff]  ;;  %vm68_vm0 = vcmask 64512   ;;  %s275_s0 = smov [#allocation9]  }
  0x1c   :  { %v53_v7 = vmul.f32 %v52_v2, %v49_v5  ;;  %v62_v9 = vld [vmem:[%s338_s2] sm:$0xff]  ;;  %s161_s13 = sshll.u32 %s275_s0, 4  ;;  %s162_s13 = int_to_ptr.vmem [resolvable:$true] %s161_s13 }
  0x1d   :  { %65 = vperm.xlu0 %182, %v62_v9   ;;  %v60_v10 = vadd.f32 %v58_v4, %v54_v6  ;;  %56 = vst [vmem:[#allocation9 + $0x8] sm:$0xff] %v54_v6  ;;  %v61_v12 = vld [vmem:[#allocation3] sm:$0xff]  ;;  %s223_s4 = scalar_lea.vmem %s162_s13, 256  ;;  %p228_p11 = scmp.lt.s32.totalorder %s162_s13, %s162_s13 }
  0x1e   :  { %v59_v11 = vadd.f32 %v57_v8, %v53_v7  ;;  %55 = vst [vmem:[#allocation9] sm:$0xff] %v53_v7  ;;  %p224_p10 = scmp.ne.s32.totalorder %s162_s13, %s223_s4  ;;  %p229_p12 = scmp.lt.s32.totalorder %s223_s4, %s223_s4 }
  0x1f   :  { %102 = vmatprep.subr.mxu0 %v60_v10 }
  0x20   :  { %103 = vmatpush1.msra.mxu0 %v59_v11  ;;  %p230_p13 = por %p229_p12, %p228_p11 }
  0x21   :  { %175 = vmatmul.mubr.msk.f32.vlgmr.msra.gmra.mxu0 %vm68_vm0, %v61_v12 }
  0x22   :  { %p231_p0 = pnand %p230_p13, %p224_p10 }
  0x24   :  { %234 = shalt.err (!%p231_p0)
}
  0x25   :  { %164 = dma.vmem_to_hbm [thread:$0]  %s162_s13, 256, %s342_s6, [#allocation10]  }
  0x26   :  { %s276_s15 = smov [#allocation8]  }
  0x27   :  { %s151_s16 = sshll.u32 %s276_s15, 4  ;;  %s152_s16 = int_to_ptr.vmem [resolvable:$true] %s151_s16 }
  0x28   :  { %s243_s17 = scalar_lea.vmem %s152_s16, 256  ;;  %p248_p2 = scmp.lt.s32.totalorder %s152_s16, %s152_s16 }
  0x29   :  { %p244_p1 = scmp.ne.s32.totalorder %s152_s16, %s243_s17  ;;  %p249_p3 = scmp.lt.s32.totalorder %s243_s17, %s243_s17 }
  0x2b   :  { %p250_p4 = por %p249_p3, %p248_p2 }
  0x2d   :  { %p251_p5 = pnand %p250_p4, %p244_p1 }
  0x98   :  { %v66_v13 = vpop.permute.xlu0 %65 }
  0xe1   :  { %v138_v14 = vpop.f32.mrf.mxu0 }
  0xe2   :  { %v139_v15 = vadd.f32 %v138_v14, %v66_v13 }
  0xe3   :  { %v140_v16 = vpop.f32.mrf.mxu0 }
  0xe4   :  { %143 = vst [vmem:[#allocation8] sm:$0xff] %v139_v15  ;;  %v141_v17 = vadd.f32 %v140_v16, %v66_v13 }
  0xe6   :  { %144 = vst [vmem:[#allocation8 + $0x8] sm:$0xff] %v141_v17 }
  0xe7   :  { %254 = shalt.err (!%p251_p5)
}
  0xe8   :  { %154 = dma.vmem_to_hbm [thread:$0]  %s152_s16, 256, %s341_s5, [#allocation5]  }
  0xe9   :  { %267 = dma.done.wait [#allocation5], 256  }
  0xea   :  { %268 = vsyncadd [#allocation5], 4294967040 }
  0xeb   :  { %269 = dma.done.wait [#allocation10], 256  }
  0xec   :  { %270 = vsyncadd [#allocation10], 4294967040 }
  0xed   :  { %171 = vsyncpa [#allocation4], 1 }
  0xee   :  { %172 = vsyncpa [#allocation7], 1 }
  0xef   :  { %173 = vsyncpa [#allocation5], 1 }
  0xf0   :  { %174 = vsyncpa [#allocation10], 1 }

</bundles_post_ra>
